<compile_context>
chip_gen: v6e
topology: v6e:2x2x1
jax: 0.10.0
libtpu: 0.0.40
codegen_flags: <defaults>
</compile_context>

<pallas_src>
import functools
import math

import jax
import jax.numpy as jnp
from jax.experimental import pallas as pl
from jax.experimental.pallas import tpu as pltpu  # noqa: F401  (TPU backend assumed)


def _layer_norm(x, gamma, beta, eps=1e-5):
    mean = jnp.mean(x, axis=-1, keepdims=True)
    var = jnp.mean((x - mean) ** 2, axis=-1, keepdims=True)
    return (x - mean) * jax.lax.rsqrt(var + eps) * gamma + beta


def _gelu(x):
    # TODO(synk): nn.GELU() default is the exact erf-based GELU; erf has no clean
    # Mosaic lowering, so the tanh approximation is used (≈1e-3-level deviation).
    c = math.sqrt(2.0 / math.pi)
    return 0.5 * x * (1.0 + jnp.tanh(c * (x + 0.044715 * x * x * x)))


def _encoder_stack_kernel(
    x_ref, c_ref,
    wq_ref, wk_ref, wv_ref, bq_ref, bk_ref, bv_ref,
    wob_ref, bo_ref,
    g1_ref, be1_ref,
    w1_ref, b1_ref, w2_ref, b2_ref,
    g2_ref, be2_ref,
    o_ref,
    *, num_layers, num_heads, batch, seq_q, seq_kv, self_condition,
):
    H = num_heads
    B = batch
    D = x_ref.shape[-1]
    dh = D // H
    scale = 1.0 / math.sqrt(dh)

    def to_heads(t, s_len):
        # (B*s_len, D) -> (H*B, s_len, dh): static lane slices, leading-dim
        # reshapes and a major-axis concat only (no lane-axis concatenation).
        parts = [t[:, h * dh:(h + 1) * dh].reshape(1, B, s_len, dh)
                 for h in range(H)]
        return jnp.concatenate(parts, axis=0).reshape(H * B, s_len, dh)

    x = x_ref[...].astype(jnp.float32)                       # (B*S, D)
    c = x if self_condition else c_ref[...].astype(jnp.float32)

    for l in range(num_layers):
        # --- QKV projections: flat 2-D matmuls over the whole (B*S, D) slab ---
        q = jnp.dot(x, wq_ref[l], preferred_element_type=jnp.float32) + bq_ref[l]
        k = jnp.dot(c, wk_ref[l], preferred_element_type=jnp.float32) + bk_ref[l]
        v = jnp.dot(c, wv_ref[l], preferred_element_type=jnp.float32) + bv_ref[l]

        # --- multi-head scaled dot-product attention, batched over (head, batch) ---
        qh = to_heads(q, seq_q)        # (H*B, S,  dh)
        kh = to_heads(k, seq_kv)       # (H*B, Sk, dh)
        vh = to_heads(v, seq_kv)       # (H*B, Sk, dh)

        s = jnp.einsum("nqd,nkd->nqk", qh, kh,
                       preferred_element_type=jnp.float32) * scale
        s = s - jnp.max(s, axis=-1, keepdims=True)
        p = jnp.exp(s)
        p = p * pl.reciprocal(jnp.sum(p, axis=-1, keepdims=True), approx=True)
        attn = jnp.einsum("nqk,nkd->nqd", p, vh,
                          preferred_element_type=jnp.float32)       # (H*B, S, dh)

        # --- output projection fused with head merge: sum_h attn_h @ Wo[h] ---
        proj_h = jnp.einsum("nqd,ndk->nqk", attn, wob_ref[l],
                            preferred_element_type=jnp.float32)     # (H*B, S, D)
        proj4 = proj_h.reshape(H, B * seq_q, D)                     # flat-order reshape
        proj = proj4[0]
        for h in range(1, H):
            proj = proj + proj4[h]
        proj = proj + bo_ref[l]                                     # (B*S, D)

        # --- Add & LayerNorm 1 ---
        h1 = _layer_norm(proj + x, g1_ref[l], be1_ref[l])

        # --- FeedForward: Linear -> GELU -> (dropout identity) -> Linear ---
        ff = _gelu(jnp.dot(h1, w1_ref[l], preferred_element_type=jnp.float32)
                   + b1_ref[l])
        ff = jnp.dot(ff, w2_ref[l], preferred_element_type=jnp.float32) + b2_ref[l]

        # --- Add & LayerNorm 2 ---
        x = _layer_norm(ff + h1, g2_ref[l], be2_ref[l])
        if self_condition:
            c = x

    o_ref[...] = x.astype(o_ref.dtype)


def encoder_layers(x, input_mask, layer_params, num_heads,
                   condition_seq=None, condition_mask=None):
    """Fused forward of a stack of EncoderLayers in a single pallas_call.

    input_mask / condition_mask are accepted for API fidelity; the PyTorch
    forward computes but never applies them (attn_mask=None, key_padding_mask=None).
    """
    del input_mask, condition_mask
    B, S, D = x.shape
    H = num_heads
    dh = D // H
    self_condition = condition_seq is None
    cond = x if self_condition else condition_seq
    Bc, Sc, _ = cond.shape
    L = len(layer_params)

    # Host-side weight packing (free at trace time): stack layers; pre-shape Wo
    # per head and pre-broadcast across batch so the kernel needs no transposes.
    def stacked(name):
        return jnp.stack([p[name] for p in layer_params], axis=0)

    wob = jnp.stack(
        [jnp.broadcast_to(p["wo"].reshape(H, dh, D)[:, None], (H, B, dh, D))
             .reshape(H * B, dh, D)
         for p in layer_params],
        axis=0)                                     # (L, H*B, dh, D)

    args = [x.reshape(B * S, D), cond.reshape(Bc * Sc, D),
            stacked("wq"), stacked("wk"), stacked("wv"),
            stacked("bq"), stacked("bk"), stacked("bv"),
            wob, stacked("bo"),
            stacked("g1"), stacked("be1"),
            stacked("w1"), stacked("b1"), stacked("w2"), stacked("b2"),
            stacked("g2"), stacked("be2")]

    kernel = functools.partial(
        _encoder_stack_kernel,
        num_layers=L, num_heads=H, batch=B, seq_q=S, seq_kv=Sc,
        self_condition=self_condition,
    )
    # Gridless call: the whole (tiny) problem lives in VMEM for one invocation,
    # so there is zero grid-step overhead and every weight is single-buffered.
    # TODO(synk): for realistic hidden sizes / long sequences, add a "parallel"
    # grid over lane-dense row tiles of B*S plus KV / FFN reduction axes so the
    # working set fits v7x's 64 MiB VMEM.
    out = pl.pallas_call(
        kernel,
        out_shape=jax.ShapeDtypeStruct((B * S, D), x.dtype),
    )(*args)
    return out.reshape(B, S, D)


def encoder_layer(x, input_mask, params, num_heads,
                  condition_seq=None, condition_mask=None):
    """Single EncoderLayer forward (matches the PyTorch module)."""
    return encoder_layers(x, input_mask, [params], num_heads,
                          condition_seq, condition_mask)


def init_layer_params(key, hidden, intermediate):
    ks = jax.random.split(key, 8)
    rnd = lambda k, shape: jax.random.normal(k, shape, jnp.float32) * 0.02
    return {
        # nn.MultiheadAttention in_proj split into Q/K/V, stored as (in, out)
        "wq": rnd(ks[0], (hidden, hidden)),
        "wk": rnd(ks[1], (hidden, hidden)),
        "wv": rnd(ks[2], (hidden, hidden)),
        "bq": jnp.zeros((1, hidden), jnp.float32),
        "bk": jnp.zeros((1, hidden), jnp.float32),
        "bv": jnp.zeros((1, hidden), jnp.float32),
        "wo": rnd(ks[3], (hidden, hidden)),
        "bo": rnd(ks[4], (1, hidden)),
        # AddNormalBlock 1 (LayerNorm affine)
        "g1": jnp.ones((1, hidden), jnp.float32),
        "be1": jnp.zeros((1, hidden), jnp.float32),
        # FeedForward
        "w1": rnd(ks[5], (hidden, intermediate)),
        "b1": rnd(ks[6], (1, intermediate)),
        "w2": rnd(ks[7], (intermediate, hidden)),
        "b2": jnp.zeros((1, hidden), jnp.float32),
        # AddNormalBlock 2
        "g2": jnp.ones((1, hidden), jnp.float32),
        "be2": jnp.zeros((1, hidden), jnp.float32),
    }


if __name__ == "__main__":
    B, S = 2, 8
    hidden_size = 32
    num_attention_heads = 4
    intermediate_size = 64
    num_hidden_layers = 2

    key = jax.random.PRNGKey(0)
    k_x, k_p = jax.random.split(key)

    x = jax.random.normal(k_x, (B, S, hidden_size), jnp.float32)
    input_mask = jnp.ones((B, S), jnp.float32)

    layer_params = [
        init_layer_params(jax.random.fold_in(k_p, i), hidden_size, intermediate_size)
        for i in range(num_hidden_layers)
    ]

    # Single EncoderLayer (exactly the PyTorch module's forward) ...
    out_single = encoder_layer(x, input_mask, layer_params[0], num_attention_heads)
    # ... and a fused 2-layer stack in one pallas_call (layer-fusion optimization).
    out_stack = encoder_layers(x, input_mask, layer_params, num_attention_heads)

    out_single, out_stack = jax.block_until_ready((out_single, out_stack))
    assert out_single.shape == (B, S, hidden_size)
    assert out_stack.shape == (B, S, hidden_size)
    print("KERNEL_OK")
</pallas_src>

<mosaic_0001>
module attributes {stable_mosaic.version = 11 : i64} {
  func.func @_encoder_stack_kernel(%arg0: memref<16x32xf32, #tpu.memory_space<vmem>>, %arg1: memref<16x32xf32, #tpu.memory_space<vmem>>, %arg2: memref<1x32x32xf32, #tpu.memory_space<vmem>>, %arg3: memref<1x32x32xf32, #tpu.memory_space<vmem>>, %arg4: memref<1x32x32xf32, #tpu.memory_space<vmem>>, %arg5: memref<1x1x32xf32, #tpu.memory_space<vmem>>, %arg6: memref<1x1x32xf32, #tpu.memory_space<vmem>>, %arg7: memref<1x1x32xf32, #tpu.memory_space<vmem>>, %arg8: memref<1x8x8x32xf32, #tpu.memory_space<vmem>>, %arg9: memref<1x1x32xf32, #tpu.memory_space<vmem>>, %arg10: memref<1x1x32xf32, #tpu.memory_space<vmem>>, %arg11: memref<1x1x32xf32, #tpu.memory_space<vmem>>, %arg12: memref<1x32x64xf32, #tpu.memory_space<vmem>>, %arg13: memref<1x1x64xf32, #tpu.memory_space<vmem>>, %arg14: memref<1x64x32xf32, #tpu.memory_space<vmem>>, %arg15: memref<1x1x32xf32, #tpu.memory_space<vmem>>, %arg16: memref<1x1x32xf32, #tpu.memory_space<vmem>>, %arg17: memref<1x1x32xf32, #tpu.memory_space<vmem>>, %arg18: memref<16x32xf32, #tpu.memory_space<vmem>>) attributes {dimension_semantics = [], scalar_prefetch = 0 : i64, scratch_operands = 0 : i64, tpu.core_type = #tpu.core_type<tc>} {
    %c0 = arith.constant 0 : index
    %c0_0 = arith.constant 0 : index
    %0 = vector.load %arg0[%c0, %c0_0] : memref<16x32xf32, #tpu.memory_space<vmem>>, vector<16x32xf32>
    %c0_1 = arith.constant 0 : index
    %c0_2 = arith.constant 0 : index
    %c0_3 = arith.constant 0 : index
    %1 = vector.load %arg2[%c0_1, %c0_2, %c0_3] : memref<1x32x32xf32, #tpu.memory_space<vmem>>, vector<1x32x32xf32>
    %2 = vector.shape_cast %1 : vector<1x32x32xf32> to vector<32x32xf32>
    %cst = arith.constant dense<0.000000e+00> : vector<16x32xf32>
    %3 = tpu.matmul %0, %2, %cst {dimension_numbers = #tpu.dot_dimension_numbers<[1], [0], [0], [1], [0, 0, 1, 1], [], []>} : vector<16x32xf32>, vector<32x32xf32>, vector<16x32xf32> -> vector<16x32xf32>
    %c0_4 = arith.constant 0 : index
    %c0_5 = arith.constant 0 : index
    %c0_6 = arith.constant 0 : index
    %4 = vector.load %arg5[%c0_4, %c0_5, %c0_6] : memref<1x1x32xf32, #tpu.memory_space<vmem>>, vector<1x1x32xf32>
    %5 = vector.shape_cast %4 : vector<1x1x32xf32> to vector<1x32xf32>
    %6 = vector.broadcast %5 : vector<1x32xf32> to vector<16x32xf32>
    %7 = arith.addf %3, %6 : vector<16x32xf32>
    %c0_7 = arith.constant 0 : index
    %c0_8 = arith.constant 0 : index
    %c0_9 = arith.constant 0 : index
    %8 = vector.load %arg3[%c0_7, %c0_8, %c0_9] : memref<1x32x32xf32, #tpu.memory_space<vmem>>, vector<1x32x32xf32>
    %9 = vector.shape_cast %8 : vector<1x32x32xf32> to vector<32x32xf32>
    %cst_10 = arith.constant dense<0.000000e+00> : vector<16x32xf32>
    %10 = tpu.matmul %0, %9, %cst_10 {dimension_numbers = #tpu.dot_dimension_numbers<[1], [0], [0], [1], [0, 0, 1, 1], [], []>} : vector<16x32xf32>, vector<32x32xf32>, vector<16x32xf32> -> vector<16x32xf32>
    %c0_11 = arith.constant 0 : index
    %c0_12 = arith.constant 0 : index
    %c0_13 = arith.constant 0 : index
    %11 = vector.load %arg6[%c0_11, %c0_12, %c0_13] : memref<1x1x32xf32, #tpu.memory_space<vmem>>, vector<1x1x32xf32>
    %12 = vector.shape_cast %11 : vector<1x1x32xf32> to vector<1x32xf32>
    %13 = vector.broadcast %12 : vector<1x32xf32> to vector<16x32xf32>
    %14 = arith.addf %10, %13 : vector<16x32xf32>
    %c0_14 = arith.constant 0 : index
    %c0_15 = arith.constant 0 : index
    %c0_16 = arith.constant 0 : index
    %15 = vector.load %arg4[%c0_14, %c0_15, %c0_16] : memref<1x32x32xf32, #tpu.memory_space<vmem>>, vector<1x32x32xf32>
    %16 = vector.shape_cast %15 : vector<1x32x32xf32> to vector<32x32xf32>
    %cst_17 = arith.constant dense<0.000000e+00> : vector<16x32xf32>
    %17 = tpu.matmul %0, %16, %cst_17 {dimension_numbers = #tpu.dot_dimension_numbers<[1], [0], [0], [1], [0, 0, 1, 1], [], []>} : vector<16x32xf32>, vector<32x32xf32>, vector<16x32xf32> -> vector<16x32xf32>
    %c0_18 = arith.constant 0 : index
    %c0_19 = arith.constant 0 : index
    %c0_20 = arith.constant 0 : index
    %18 = vector.load %arg7[%c0_18, %c0_19, %c0_20] : memref<1x1x32xf32, #tpu.memory_space<vmem>>, vector<1x1x32xf32>
    %19 = vector.shape_cast %18 : vector<1x1x32xf32> to vector<1x32xf32>
    %20 = vector.broadcast %19 : vector<1x32xf32> to vector<16x32xf32>
    %21 = arith.addf %17, %20 : vector<16x32xf32>
    %22 = vector.extract_strided_slice %7 {offsets = [0, 0], sizes = [16, 8], strides = [1, 1]} : vector<16x32xf32> to vector<16x8xf32>
    %23 = vector.shape_cast %22 : vector<16x8xf32> to vector<1x2x8x8xf32>
    %24 = vector.extract_strided_slice %7 {offsets = [0, 8], sizes = [16, 8], strides = [1, 1]} : vector<16x32xf32> to vector<16x8xf32>
    %25 = vector.shape_cast %24 : vector<16x8xf32> to vector<1x2x8x8xf32>
    %26 = vector.extract_strided_slice %7 {offsets = [0, 16], sizes = [16, 8], strides = [1, 1]} : vector<16x32xf32> to vector<16x8xf32>
    %27 = vector.shape_cast %26 : vector<16x8xf32> to vector<1x2x8x8xf32>
    %28 = vector.extract_strided_slice %7 {offsets = [0, 24], sizes = [16, 8], strides = [1, 1]} : vector<16x32xf32> to vector<16x8xf32>
    %29 = vector.shape_cast %28 : vector<16x8xf32> to vector<1x2x8x8xf32>
    %30 = tpu.concatenate %23, %25, %27, %29 in 0 : vector<1x2x8x8xf32>, vector<1x2x8x8xf32>, vector<1x2x8x8xf32>, vector<1x2x8x8xf32> -> vector<4x2x8x8xf32>
    %31 = vector.shape_cast %30 : vector<4x2x8x8xf32> to vector<8x8x8xf32>
    %32 = vector.extract_strided_slice %14 {offsets = [0, 0], sizes = [16, 8], strides = [1, 1]} : vector<16x32xf32> to vector<16x8xf32>
    %33 = vector.shape_cast %32 : vector<16x8xf32> to vector<1x2x8x8xf32>
    %34 = vector.extract_strided_slice %14 {offsets = [0, 8], sizes = [16, 8], strides = [1, 1]} : vector<16x32xf32> to vector<16x8xf32>
    %35 = vector.shape_cast %34 : vector<16x8xf32> to vector<1x2x8x8xf32>
    %36 = vector.extract_strided_slice %14 {offsets = [0, 16], sizes = [16, 8], strides = [1, 1]} : vector<16x32xf32> to vector<16x8xf32>
    %37 = vector.shape_cast %36 : vector<16x8xf32> to vector<1x2x8x8xf32>
    %38 = vector.extract_strided_slice %14 {offsets = [0, 24], sizes = [16, 8], strides = [1, 1]} : vector<16x32xf32> to vector<16x8xf32>
    %39 = vector.shape_cast %38 : vector<16x8xf32> to vector<1x2x8x8xf32>
    %40 = tpu.concatenate %33, %35, %37, %39 in 0 : vector<1x2x8x8xf32>, vector<1x2x8x8xf32>, vector<1x2x8x8xf32>, vector<1x2x8x8xf32> -> vector<4x2x8x8xf32>
    %41 = vector.shape_cast %40 : vector<4x2x8x8xf32> to vector<8x8x8xf32>
    %42 = vector.extract_strided_slice %21 {offsets = [0, 0], sizes = [16, 8], strides = [1, 1]} : vector<16x32xf32> to vector<16x8xf32>
    %43 = vector.shape_cast %42 : vector<16x8xf32> to vector<1x2x8x8xf32>
    %44 = vector.extract_strided_slice %21 {offsets = [0, 8], sizes = [16, 8], strides = [1, 1]} : vector<16x32xf32> to vector<16x8xf32>
    %45 = vector.shape_cast %44 : vector<16x8xf32> to vector<1x2x8x8xf32>
    %46 = vector.extract_strided_slice %21 {offsets = [0, 16], sizes = [16, 8], strides = [1, 1]} : vector<16x32xf32> to vector<16x8xf32>
    %47 = vector.shape_cast %46 : vector<16x8xf32> to vector<1x2x8x8xf32>
    %48 = vector.extract_strided_slice %21 {offsets = [0, 24], sizes = [16, 8], strides = [1, 1]} : vector<16x32xf32> to vector<16x8xf32>
    %49 = vector.shape_cast %48 : vector<16x8xf32> to vector<1x2x8x8xf32>
    %50 = tpu.concatenate %43, %45, %47, %49 in 0 : vector<1x2x8x8xf32>, vector<1x2x8x8xf32>, vector<1x2x8x8xf32>, vector<1x2x8x8xf32> -> vector<4x2x8x8xf32>
    %51 = vector.shape_cast %50 : vector<4x2x8x8xf32> to vector<8x8x8xf32>
    "tpu.trace_start"() <{level = 10 : i32, message = "nqd,nkd->nqk"}> : () -> ()
    %cst_21 = arith.constant dense<0.000000e+00> : vector<8x8x8xf32>
    %52 = tpu.matmul %31, %41, %cst_21 {dimension_numbers = #tpu.dot_dimension_numbers<[2], [2], [1], [1], [0, 0, 0, 1, 1, 1], [0], [0]>} : vector<8x8x8xf32>, vector<8x8x8xf32>, vector<8x8x8xf32> -> vector<8x8x8xf32>
    "tpu.trace_stop"() : () -> ()
    %cst_22 = arith.constant 0.353553385 : f32
    %53 = vector.broadcast %cst_22 : f32 to vector<8x8x8xf32>
    %54 = arith.mulf %52, %53 : vector<8x8x8xf32>
    %cst_23 = arith.constant dense<0xFF800000> : vector<8x8xf32>
    %55 = vector.multi_reduction <maximumf>, %54, %cst_23 [2] : vector<8x8x8xf32> to vector<8x8xf32>
    %56 = vector.shape_cast %55 : vector<8x8xf32> to vector<8x8x1xf32>
    %57 = vector.broadcast %56 : vector<8x8x1xf32> to vector<8x8x8xf32>
    %58 = arith.subf %54, %57 : vector<8x8x8xf32>
    %59 = math.exp %58 : vector<8x8x8xf32>
    %cst_24 = arith.constant dense<0.000000e+00> : vector<8x8xf32>
    %60 = vector.multi_reduction <add>, %59, %cst_24 [2] : vector<8x8x8xf32> to vector<8x8xf32>
    %61 = vector.shape_cast %60 : vector<8x8xf32> to vector<8x8x1xf32>
    %62 = tpu.reciprocal %61 {approx = true} : vector<8x8x1xf32> -> vector<8x8x1xf32>
    %63 = vector.broadcast %62 : vector<8x8x1xf32> to vector<8x8x8xf32>
    %64 = arith.mulf %59, %63 : vector<8x8x8xf32>
    "tpu.trace_start"() <{level = 10 : i32, message = "nqk,nkd->nqd"}> : () -> ()
    %cst_25 = arith.constant dense<0.000000e+00> : vector<8x8x8xf32>
    %65 = tpu.matmul %64, %51, %cst_25 {dimension_numbers = #tpu.dot_dimension_numbers<[2], [1], [1], [2], [0, 0, 0, 1, 1, 2], [0], [0]>} : vector<8x8x8xf32>, vector<8x8x8xf32>, vector<8x8x8xf32> -> vector<8x8x8xf32>
    "tpu.trace_stop"() : () -> ()
    %c0_26 = arith.constant 0 : index
    %c0_27 = arith.constant 0 : index
    %c0_28 = arith.constant 0 : index
    %c0_29 = arith.constant 0 : index
    %66 = vector.load %arg8[%c0_26, %c0_27, %c0_28, %c0_29] : memref<1x8x8x32xf32, #tpu.memory_space<vmem>>, vector<1x8x8x32xf32>
    %67 = vector.shape_cast %66 : vector<1x8x8x32xf32> to vector<8x8x32xf32>
    "tpu.trace_start"() <{level = 10 : i32, message = "nqd,ndk->nqk"}> : () -> ()
    %cst_30 = arith.constant dense<0.000000e+00> : vector<8x8x32xf32>
    %68 = tpu.matmul %65, %67, %cst_30 {dimension_numbers = #tpu.dot_dimension_numbers<[2], [1], [1], [2], [0, 0, 0, 1, 1, 2], [0], [0]>} : vector<8x8x8xf32>, vector<8x8x32xf32>, vector<8x8x32xf32> -> vector<8x8x32xf32>
    "tpu.trace_stop"() : () -> ()
    %69 = vector.shape_cast %68 : vector<8x8x32xf32> to vector<4x16x32xf32>
    %70 = vector.extract_strided_slice %69 {offsets = [0, 0, 0], sizes = [1, 16, 32], strides = [1, 1, 1]} : vector<4x16x32xf32> to vector<1x16x32xf32>
    %71 = vector.shape_cast %70 : vector<1x16x32xf32> to vector<16x32xf32>
    %72 = vector.extract_strided_slice %69 {offsets = [1, 0, 0], sizes = [1, 16, 32], strides = [1, 1, 1]} : vector<4x16x32xf32> to vector<1x16x32xf32>
    %73 = vector.shape_cast %72 : vector<1x16x32xf32> to vector<16x32xf32>
    %74 = arith.addf %71, %73 : vector<16x32xf32>
    %75 = vector.extract_strided_slice %69 {offsets = [2, 0, 0], sizes = [1, 16, 32], strides = [1, 1, 1]} : vector<4x16x32xf32> to vector<1x16x32xf32>
    %76 = vector.shape_cast %75 : vector<1x16x32xf32> to vector<16x32xf32>
    %77 = arith.addf %74, %76 : vector<16x32xf32>
    %78 = vector.extract_strided_slice %69 {offsets = [3, 0, 0], sizes = [1, 16, 32], strides = [1, 1, 1]} : vector<4x16x32xf32> to vector<1x16x32xf32>
    %79 = vector.shape_cast %78 : vector<1x16x32xf32> to vector<16x32xf32>
    %80 = arith.addf %77, %79 : vector<16x32xf32>
    %c0_31 = arith.constant 0 : index
    %c0_32 = arith.constant 0 : index
    %c0_33 = arith.constant 0 : index
    %81 = vector.load %arg9[%c0_31, %c0_32, %c0_33] : memref<1x1x32xf32, #tpu.memory_space<vmem>>, vector<1x1x32xf32>
    %82 = vector.shape_cast %81 : vector<1x1x32xf32> to vector<1x32xf32>
    %83 = vector.broadcast %82 : vector<1x32xf32> to vector<16x32xf32>
    %84 = arith.addf %80, %83 : vector<16x32xf32>
    %85 = arith.addf %84, %0 : vector<16x32xf32>
    %c0_34 = arith.constant 0 : index
    %c0_35 = arith.constant 0 : index
    %c0_36 = arith.constant 0 : index
    %86 = vector.load %arg10[%c0_34, %c0_35, %c0_36] : memref<1x1x32xf32, #tpu.memory_space<vmem>>, vector<1x1x32xf32>
    %87 = vector.shape_cast %86 : vector<1x1x32xf32> to vector<1x32xf32>
    %c0_37 = arith.constant 0 : index
    %c0_38 = arith.constant 0 : index
    %c0_39 = arith.constant 0 : index
    %88 = vector.load %arg11[%c0_37, %c0_38, %c0_39] : memref<1x1x32xf32, #tpu.memory_space<vmem>>, vector<1x1x32xf32>
    %89 = vector.shape_cast %88 : vector<1x1x32xf32> to vector<1x32xf32>
    %cst_40 = arith.constant dense<0.000000e+00> : vector<16xf32>
    %90 = vector.multi_reduction <add>, %85, %cst_40 [1] : vector<16x32xf32> to vector<16xf32>
    %91 = vector.shape_cast %90 : vector<16xf32> to vector<16x1xf32>
    %cst_41 = arith.constant 3.200000e+01 : f32
    %92 = vector.broadcast %cst_41 : f32 to vector<16x1xf32>
    %93 = arith.divf %91, %92 : vector<16x1xf32>
    %94 = vector.broadcast %93 : vector<16x1xf32> to vector<16x32xf32>
    %95 = arith.subf %85, %94 : vector<16x32xf32>
    %96 = arith.mulf %95, %95 : vector<16x32xf32>
    %cst_42 = arith.constant dense<0.000000e+00> : vector<16xf32>
    %97 = vector.multi_reduction <add>, %96, %cst_42 [1] : vector<16x32xf32> to vector<16xf32>
    %98 = vector.shape_cast %97 : vector<16xf32> to vector<16x1xf32>
    %cst_43 = arith.constant 3.200000e+01 : f32
    %99 = vector.broadcast %cst_43 : f32 to vector<16x1xf32>
    %100 = arith.divf %98, %99 : vector<16x1xf32>
    %101 = vector.broadcast %93 : vector<16x1xf32> to vector<16x32xf32>
    %102 = arith.subf %85, %101 : vector<16x32xf32>
    %cst_44 = arith.constant 9.99999974E-6 : f32
    %103 = vector.broadcast %cst_44 : f32 to vector<16x1xf32>
    %104 = arith.addf %100, %103 : vector<16x1xf32>
    %105 = math.rsqrt %104 : vector<16x1xf32>
    %106 = vector.broadcast %105 : vector<16x1xf32> to vector<16x32xf32>
    %107 = arith.mulf %102, %106 : vector<16x32xf32>
    %108 = vector.broadcast %87 : vector<1x32xf32> to vector<16x32xf32>
    %109 = arith.mulf %107, %108 : vector<16x32xf32>
    %110 = vector.broadcast %89 : vector<1x32xf32> to vector<16x32xf32>
    %111 = arith.addf %109, %110 : vector<16x32xf32>
    %c0_45 = arith.constant 0 : index
    %c0_46 = arith.constant 0 : index
    %c0_47 = arith.constant 0 : index
    %112 = vector.load %arg12[%c0_45, %c0_46, %c0_47] : memref<1x32x64xf32, #tpu.memory_space<vmem>>, vector<1x32x64xf32>
    %113 = vector.shape_cast %112 : vector<1x32x64xf32> to vector<32x64xf32>
    %cst_48 = arith.constant dense<0.000000e+00> : vector<16x64xf32>
    %114 = tpu.matmul %111, %113, %cst_48 {dimension_numbers = #tpu.dot_dimension_numbers<[1], [0], [0], [1], [0, 0, 1, 1], [], []>} : vector<16x32xf32>, vector<32x64xf32>, vector<16x64xf32> -> vector<16x64xf32>
    %c0_49 = arith.constant 0 : index
    %c0_50 = arith.constant 0 : index
    %c0_51 = arith.constant 0 : index
    %115 = vector.load %arg13[%c0_49, %c0_50, %c0_51] : memref<1x1x64xf32, #tpu.memory_space<vmem>>, vector<1x1x64xf32>
    %116 = vector.shape_cast %115 : vector<1x1x64xf32> to vector<1x64xf32>
    %117 = vector.broadcast %116 : vector<1x64xf32> to vector<16x64xf32>
    %118 = arith.addf %114, %117 : vector<16x64xf32>
    %cst_52 = arith.constant 5.000000e-01 : f32
    %119 = vector.broadcast %cst_52 : f32 to vector<16x64xf32>
    %120 = arith.mulf %119, %118 : vector<16x64xf32>
    %cst_53 = arith.constant 4.471500e-02 : f32
    %121 = vector.broadcast %cst_53 : f32 to vector<16x64xf32>
    %122 = arith.mulf %121, %118 : vector<16x64xf32>
    %123 = arith.mulf %122, %118 : vector<16x64xf32>
    %124 = arith.mulf %123, %118 : vector<16x64xf32>
    %125 = arith.addf %118, %124 : vector<16x64xf32>
    %cst_54 = arith.constant 0.797884583 : f32
    %126 = vector.broadcast %cst_54 : f32 to vector<16x64xf32>
    %127 = arith.mulf %126, %125 : vector<16x64xf32>
    %128 = math.tanh %127 : vector<16x64xf32>
    %cst_55 = arith.constant 1.000000e+00 : f32
    %129 = vector.broadcast %cst_55 : f32 to vector<16x64xf32>
    %130 = arith.addf %129, %128 : vector<16x64xf32>
    %131 = arith.mulf %120, %130 : vector<16x64xf32>
    %c0_56 = arith.constant 0 : index
    %c0_57 = arith.constant 0 : index
    %c0_58 = arith.constant 0 : index
    %132 = vector.load %arg14[%c0_56, %c0_57, %c0_58] : memref<1x64x32xf32, #tpu.memory_space<vmem>>, vector<1x64x32xf32>
    %133 = vector.shape_cast %132 : vector<1x64x32xf32> to vector<64x32xf32>
    %cst_59 = arith.constant dense<0.000000e+00> : vector<16x32xf32>
    %134 = tpu.matmul %131, %133, %cst_59 {dimension_numbers = #tpu.dot_dimension_numbers<[1], [0], [0], [1], [0, 0, 1, 1], [], []>} : vector<16x64xf32>, vector<64x32xf32>, vector<16x32xf32> -> vector<16x32xf32>
    %c0_60 = arith.constant 0 : index
    %c0_61 = arith.constant 0 : index
    %c0_62 = arith.constant 0 : index
    %135 = vector.load %arg15[%c0_60, %c0_61, %c0_62] : memref<1x1x32xf32, #tpu.memory_space<vmem>>, vector<1x1x32xf32>
    %136 = vector.shape_cast %135 : vector<1x1x32xf32> to vector<1x32xf32>
    %137 = vector.broadcast %136 : vector<1x32xf32> to vector<16x32xf32>
    %138 = arith.addf %134, %137 : vector<16x32xf32>
    %139 = arith.addf %138, %111 : vector<16x32xf32>
    %c0_63 = arith.constant 0 : index
    %c0_64 = arith.constant 0 : index
    %c0_65 = arith.constant 0 : index
    %140 = vector.load %arg16[%c0_63, %c0_64, %c0_65] : memref<1x1x32xf32, #tpu.memory_space<vmem>>, vector<1x1x32xf32>
    %141 = vector.shape_cast %140 : vector<1x1x32xf32> to vector<1x32xf32>
    %c0_66 = arith.constant 0 : index
    %c0_67 = arith.constant 0 : index
    %c0_68 = arith.constant 0 : index
    %142 = vector.load %arg17[%c0_66, %c0_67, %c0_68] : memref<1x1x32xf32, #tpu.memory_space<vmem>>, vector<1x1x32xf32>
    %143 = vector.shape_cast %142 : vector<1x1x32xf32> to vector<1x32xf32>
    %cst_69 = arith.constant dense<0.000000e+00> : vector<16xf32>
    %144 = vector.multi_reduction <add>, %139, %cst_69 [1] : vector<16x32xf32> to vector<16xf32>
    %145 = vector.shape_cast %144 : vector<16xf32> to vector<16x1xf32>
    %cst_70 = arith.constant 3.200000e+01 : f32
    %146 = vector.broadcast %cst_70 : f32 to vector<16x1xf32>
    %147 = arith.divf %145, %146 : vector<16x1xf32>
    %148 = vector.broadcast %147 : vector<16x1xf32> to vector<16x32xf32>
    %149 = arith.subf %139, %148 : vector<16x32xf32>
    %150 = arith.mulf %149, %149 : vector<16x32xf32>
    %cst_71 = arith.constant dense<0.000000e+00> : vector<16xf32>
    %151 = vector.multi_reduction <add>, %150, %cst_71 [1] : vector<16x32xf32> to vector<16xf32>
    %152 = vector.shape_cast %151 : vector<16xf32> to vector<16x1xf32>
    %cst_72 = arith.constant 3.200000e+01 : f32
    %153 = vector.broadcast %cst_72 : f32 to vector<16x1xf32>
    %154 = arith.divf %152, %153 : vector<16x1xf32>
    %155 = vector.broadcast %147 : vector<16x1xf32> to vector<16x32xf32>
    %156 = arith.subf %139, %155 : vector<16x32xf32>
    %cst_73 = arith.constant 9.99999974E-6 : f32
    %157 = vector.broadcast %cst_73 : f32 to vector<16x1xf32>
    %158 = arith.addf %154, %157 : vector<16x1xf32>
    %159 = math.rsqrt %158 : vector<16x1xf32>
    %160 = vector.broadcast %159 : vector<16x1xf32> to vector<16x32xf32>
    %161 = arith.mulf %156, %160 : vector<16x32xf32>
    %162 = vector.broadcast %141 : vector<1x32xf32> to vector<16x32xf32>
    %163 = arith.mulf %161, %162 : vector<16x32xf32>
    %164 = vector.broadcast %143 : vector<1x32xf32> to vector<16x32xf32>
    %165 = arith.addf %163, %164 : vector<16x32xf32>
    %c0_74 = arith.constant 0 : index
    %c0_75 = arith.constant 0 : index
    %166 = vector.load %arg18[%c0_74, %c0_75] : memref<16x32xf32, #tpu.memory_space<vmem>>, vector<16x32xf32>
    tpu.vector_store %arg18[%c0_74, %c0_75], %165 {strides = array<i32>} : memref<16x32xf32, #tpu.memory_space<vmem>>, vector<16x32xf32>,
    return
  }
}

</mosaic_0001>

<bundles_post_ra>
// kernel: tpu_custom_call.1
= control target key start
LH: loop header
LB: loop body
LE: loop exit
PB: predicated region body
PF: predicated region fallthrough
CT: control target
= control target key end

     0   :  { %s3572_s0 = inlined_call_operand.hbm [shape: f32[16,32], index: 0, kind: input, shape index: {}]   ;;  %s3573_s1 = inlined_call_operand.hbm [shape: f32[16,32], index: 1, kind: input, shape index: {}]   ;;  %s3574_s2 = inlined_call_operand.vmem [shape: f32[1,32,32], index: 2, kind: input, shape index: {}]   ;;  %s3575_s3 = inlined_call_operand.hbm [shape: f32[1,32,32], index: 3, kind: input, shape index: {}]   ;;  %s3576_s4 = inlined_call_operand.hbm [shape: f32[1,32,32], index: 4, kind: input, shape index: {}]   ;;  %s3577_s5 = inlined_call_operand.vmem [shape: f32[1,1,32], index: 5, kind: input, shape index: {}]   ;;  %s3578_s6 = inlined_call_operand.vmem [shape: f32[1,1,32], index: 6, kind: input, shape index: {}]   ;;  %s3579_s7 = inlined_call_operand.vmem [shape: f32[1,1,32], index: 7, kind: input, shape index: {}]   ;;  %s3580_s8 = inlined_call_operand.vmem [shape: f32[1,8,8,32], index: 8, kind: input, shape index: {}]   ;;  %s3581_s9 = inlined_call_operand.vmem [shape: f32[1,1,32], index: 9, kind: input, shape index: {}]   ;;  %s3582_s10 = inlined_call_operand.vmem [shape: f32[1,1,32], index: 10, kind: input, shape index: {}]   ;;  %s3583_s11 = inlined_call_operand.vmem [shape: f32[1,1,32], index: 11, kind: input, shape index: {}]   ;;  %s3584_s12 = inlined_call_operand.hbm [shape: f32[1,32,64], index: 12, kind: input, shape index: {}]   ;;  %s3585_s13 = inlined_call_operand.vmem [shape: f32[1,1,64], index: 13, kind: input, shape index: {}]   ;;  %s3586_s14 = inlined_call_operand.vmem [shape: f32[1,64,32], index: 14, kind: input, shape index: {}]   ;;  %s3587_s15 = inlined_call_operand.vmem [shape: f32[1,1,32], index: 15, kind: input, shape index: {}]   ;;  %s3588_s16 = inlined_call_operand.vmem [shape: f32[1,1,32], index: 16, kind: input, shape index: {}]   ;;  %s3589_s17 = inlined_call_operand.vmem [shape: f32[1,1,32], index: 17, kind: input, shape index: {}]   ;;  %s3590_s18 = inlined_call_operand.hbm [shape: f32[16,32], index: 18, kind: output, shape index: {}]  }
   0x1   :  { %3592 = sst [smem:[#allocation16_spill]] %s3572_s0 }
   0x2   :  { %3593 = sst [smem:[#allocation17_spill]] %s3573_s1 }
   0x3   :  { %3594 = sst [smem:[#allocation18_spill]] %s3574_s2 }
   0x4   :  { %23 = vsyncpa [#allocation3], 0 }
   0x5   :  { %24 = vsyncpa [#allocation6], 0 }
   0x6   :  { %25 = vsyncpa [#allocation9], 0 }
   0x7   :  { %26 = vsyncpa [#allocation4], 0  ;;  %s3146_s27 = smov [#allocation5]   ;;  %s3147_s29 = smov [#allocation8]  }
   0x8   :  { %s44_s28 = sshll.u32 %s3146_s27, 4  ;;  %s70_s30 = sshll.u32 %s3147_s29, 4  ;;  %s45_s28 = int_to_ptr.vmem [resolvable:$true] %s44_s28  ;;  %s71_s30 = int_to_ptr.vmem [resolvable:$true] %s70_s30 }
   0x9   :  { %s3026_s0 = scalar_lea.vmem %s45_s28, 256  ;;  %p3031_p1 = scmp.lt.s32.totalorder %s45_s28, %s45_s28 }
   0xa   :  { %p3027_p0 = scmp.ne.s32.totalorder %s45_s28, %s3026_s0  ;;  %p3032_p2 = scmp.lt.s32.totalorder %s3026_s0, %s3026_s0 }
   0xc   :  { %p3033_p3 = por %p3032_p2, %p3031_p1 }
   0xe   :  { %p3034_p4 = pnand %p3033_p3, %p3027_p0 }
  0x10   :  { %3037 = shalt.err (!%p3034_p4)
}
  0x11   :  { %s3148_s19 = smov 128   ;;  %s3149_s1 = smov 8  }
  0x12   :  { %s3595_s22 = sld [smem:[#allocation17_spill]]  ;;  %s3046_s2 = scalar_lea.vmem %s71_s30, 512 }
  0x13   :  { %p3047_p5 = scmp.ne.s32.totalorder %s71_s30, %s3046_s2  ;;  %p3051_p6 = scmp.lt.s32.totalorder %s71_s30, %s71_s30 }
  0x14   :  { %p3052_p7 = scmp.lt.s32.totalorder %s3046_s2, %s3046_s2 }
  0x16   :  { %p3053_p8 = por %p3052_p7, %p3051_p6 }
  0x18   :  { %50 = dma.hbm_to_vmem [thread:$0]  %s3595_s22, 256, %s45_s28, [#allocation6], %s3148_s19, %s3148_s19, %s3149_s1  }
  0x19   :  { %p3054_p9 = pnand %p3053_p8, %p3047_p5 }
  0x1b   :  { %3057 = shalt.err (!%p3054_p9)
}
  0x1c   :  { %76 = dma.hbm_to_vmem [thread:$0]  %s3576_s4, 512, %s71_s30, [#allocation9], %s3148_s19, %s3148_s19, %s3149_s1  }
  0x1d   :  { %s3150_s25 = smov [#allocation2]   ;;  %s3151_s27 = smov [#allocation7]  }
  0x1e   :  { %s32_s26 = sshll.u32 %s3150_s25, 4  ;;  %s58_s29 = sshll.u32 %s3151_s27, 4  ;;  %s33_s26 = int_to_ptr.vmem [resolvable:$true] %s32_s26  ;;  %s59_s29 = int_to_ptr.vmem [resolvable:$true] %s58_s29 }
  0x1f   :  { %s3066_s28 = scalar_lea.vmem %s33_s26, 256  ;;  %p3071_p11 = scmp.lt.s32.totalorder %s33_s26, %s33_s26 }
  0x20   :  { %p3067_p10 = scmp.ne.s32.totalorder %s33_s26, %s3066_s28  ;;  %p3072_p12 = scmp.lt.s32.totalorder %s3066_s28, %s3066_s28 }
  0x22   :  { %p3073_p13 = por %p3072_p12, %p3071_p11 }
  0x24   :  { %p3074_p0 = pnand %p3073_p13, %p3067_p10 }
  0x26   :  { %3077 = shalt.err (!%p3074_p0)
}
  0x27   :  { %s3596_s21 = sld [smem:[#allocation16_spill]]  ;;  %s3086_s4 = scalar_lea.vmem %s59_s29, 512 }
  0x28   :  { %p3087_p1 = scmp.ne.s32.totalorder %s59_s29, %s3086_s4  ;;  %p3091_p2 = scmp.lt.s32.totalorder %s59_s29, %s59_s29 }
  0x29   :  { %p3092_p3 = scmp.lt.s32.totalorder %s3086_s4, %s3086_s4 }
  0x2b   :  { %p3093_p4 = por %p3092_p3, %p3091_p2 }
  0x2d   :  { %38 = dma.hbm_to_vmem [thread:$0]  %s3596_s21, 256, %s33_s26, [#allocation3], %s3148_s19, %s3148_s19, %s3149_s1  }
  0x2e   :  { %p3094_p5 = pnand %p3093_p4, %p3087_p1 }
  0x30   :  { %3097 = shalt.err (!%p3094_p5)
}
  0x31   :  { %64 = dma.hbm_to_vmem [thread:$0]  %s3575_s3, 512, %s59_s29, [#allocation6], %s3148_s19, %s3148_s19, %s3149_s1  }
  0x32   :  { %s3152_s2 = smov [#allocation10]  }
  0x33   :  { %s96_s23 = sshll.u32 %s3152_s2, 4  ;;  %s97_s23 = int_to_ptr.vmem [resolvable:$true] %s96_s23 }
  0x34   :  { %s3106_s24 = scalar_lea.vmem %s97_s23, 512  ;;  %p3111_p7 = scmp.lt.s32.totalorder %s97_s23, %s97_s23 }
  0x35   :  { %p3107_p6 = scmp.ne.s32.totalorder %s97_s23, %s3106_s24  ;;  %p3112_p8 = scmp.lt.s32.totalorder %s3106_s24, %s3106_s24 }
  0x37   :  { %p3113_p9 = por %p3112_p8, %p3111_p7 }
  0x39   :  { %p3114_p10 = pnand %p3113_p9, %p3107_p6 }
  0x3b   :  { %3117 = shalt.err (!%p3114_p10)
}
  0x3c   :  { %102 = dma.hbm_to_vmem [thread:$0]  %s3584_s12, 512, %s97_s23, [#allocation9], %s3148_s19, %s3148_s19, %s3149_s1  }
  0x3d   :  { %3138 = dma.done.wait [#allocation3], 256  }
  0x3e   :  { %3139 = vsyncadd [#allocation3], 4294967040 }
  0x3f   :  { %3140 = dma.done.wait [#allocation6], 768  }
  0x40   :  { %3141 = vsyncadd [#allocation6], 4294966528 }
  0x41   :  { %3142 = dma.done.wait [#allocation9], 1024  }
  0x42   :  { %3143 = vsyncadd [#allocation9], 4294966272  ;;  %s3597_s29 = sld [smem:[#allocation18_spill]]  ;;  %v226_v1 = vld [vmem:[#allocation7 + $0x18] sm:$0xff]  ;;  %v225_v3 = vld [vmem:[#allocation7 + $0x10] sm:$0xff]  ;;  %vm141_vm0 = vcmask 261120  }
  0x43   :  { %2789 = vmatprep.subr.mxu1 %v226_v1  ;;  %v224_v5 = vld [vmem:[#allocation7 + $0x8] sm:$0xff]  ;;  %v223_v7 = vld [vmem:[#allocation7] sm:$0xff]  ;;  %v312_v10 = vld [vmem:[#allocation8 + $0x18] sm:$0xff]  ;;  %v3153_v14 = vmov 0.0   ;;  %vm3154_vm1 = vmmov 0   ;;  %vm443_vm2 = vcmask 64512  }
  0x44   :  { %2790 = vmatpush3.msra.mxu1 %v226_v1  ;;  %v3296_v8 = vld [vmem:[#allocation2] sm:$0xff]  ;;  %v3298_v9 = vld [vmem:[#allocation2 + $0x8] sm:$0xff]  ;;  %v311_v11 = vld [vmem:[#allocation8 + $0x10] sm:$0xff]  ;;  %s3155_s24 = smov 120   ;;  %vm2495_vm3 = vcmask 523264   ;;  %s3158_s26 = smov [#allocation11]  }
  0x45   :  { %2791 = vmatprep.subr.mxu1 %v225_v3  ;;  %2786 = vmatprep.mubr.msk.f32.mxu0 %vm141_vm0, %v3296_v8  ;;  %v310_v12 = vld [vmem:[#allocation8 + $0x8] sm:$0xff]  ;;  %v309_v13 = vld [vmem:[#allocation8] sm:$0xff] }
  0x46   :  { %2792 = vmatpush3.msra.mxu1 %v225_v3  ;;  %2797 = vmatprep.mubr.msk.f32.mxu1 %vm141_vm0, %v3296_v8  ;;  %v2644_v15 = vld [vmem:[%s3577_s5] ss:$0 sm:$0xff]  ;;  %s3156_s5 = smov 112  }
  0x47   :  { %2793 = vmatprep.subr.mxu1 %v224_v5  ;;  %v2647_v16 = vld [vmem:[%s3578_s6] ss:$0 sm:$0xff]  ;;  %s3157_s6 = smov 104  }
  0x48   :  { %v133_v0 = vld [vmem:[%s3597_s29 + $0x18] sm:$0xff]  ;;  %v132_v2 = vld [vmem:[%s3597_s29 + $0x10] sm:$0xff]  ;;  %v131_v4 = vld [vmem:[%s3597_s29 + $0x8] sm:$0xff]  ;;  %2794 = vmatpush3.msra.mxu1 %v224_v5 }
  0x49   :  { %2778 = vmatprep.subr.mxu0 %v133_v0  ;;  %v130_v6 = vld [vmem:[%s3597_s29] sm:$0xff]  ;;  %2795 = vmatprep.subr.mxu1 %v223_v7 }
  0x4a   :  { %2779 = vmatpush3.msra.mxu0 %v133_v0  ;;  %2796 = vmatpush3.msra.mxu1 %v223_v7  ;;  %v2650_v34 = vld [vmem:[%s3579_s7] ss:$0 sm:$0xff]  ;;  %s2630_s7 = sshll.u32 %s3158_s26, 4  ;;  %s2631_s7 = int_to_ptr.vmem [resolvable:$true] %s2630_s7 }
  0x4b   :  { %2780 = vmatprep.subr.mxu0 %v132_v2  ;;  %2798 = vmatmul.mubr.msk.f32.vlgmr.msra.gmra.mxu1 %vm141_vm0, %v3298_v9  ;;  %s3118_s3 = scalar_lea.vmem %s2631_s7, 256  ;;  %p3123_p12 = scmp.lt.s32.totalorder %s2631_s7, %s2631_s7 }
  0x4c   :  { %2781 = vmatpush3.msra.mxu0 %v132_v2  ;;  %2816 = vmatprep.subr.mxu1 %v3153_v14  ;;  %p3119_p11 = scmp.ne.s32.totalorder %s2631_s7, %s3118_s3  ;;  %p3124_p13 = scmp.lt.s32.totalorder %s3118_s3, %s3118_s3 }
  0x4d   :  { %2782 = vmatprep.subr.mxu0 %v131_v4  ;;  %2818 = vmatprep.mubr.msk.f32.mxu1 %vm3154_vm1, %v3153_v14 }
  0x4e   :  { %2783 = vmatpush3.msra.mxu0 %v131_v4  ;;  %p3125_p0 = por %p3124_p13, %p3123_p12 }
  0x4f   :  { %2784 = vmatprep.subr.mxu0 %v130_v6 }
  0x50   :  { %2785 = vmatpush3.msra.mxu0 %v130_v6  ;;  %p3126_p1 = pnand %p3125_p0, %p3119_p11 }
  0x51   :  { %2787 = vmatmul.mubr.msk.f32.vlgmr.msra.gmra.mxu0 %vm141_vm0, %v3298_v9  ;;  %2800 = vmatprep.subr.mxu0 %v312_v10 }
  0x52   :  { %2808 = vmatprep.mubr.msk.f32.mxu0 %vm141_vm0, %v3296_v8  ;;  %2801 = vmatpush3.msra.mxu0 %v312_v10 }
  0x53   :  { %2802 = vmatprep.subr.mxu0 %v311_v11 }
  0x54   :  { %2803 = vmatpush3.msra.mxu0 %v311_v11 }
  0x55   :  { %2804 = vmatprep.subr.mxu0 %v310_v12 }
  0x56   :  { %2805 = vmatpush3.msra.mxu0 %v310_v12 }
  0x57   :  { %2806 = vmatprep.subr.mxu0 %v309_v13 }
  0x58   :  { %2807 = vmatpush3.msra.mxu0 %v309_v13 }
  0x59   :  { %2809 = vmatmul.mubr.msk.f32.vlgmr.msra.gmra.mxu0 %vm141_vm0, %v3298_v9  ;;  %2811 = vmatprep.subr.mxu0 %v3153_v14 }
  0x5a   :  { %2813 = vmatprep.mubr.msk.f32.mxu0 %vm3154_vm1, %v3153_v14 }
 0x10b   :  { %v2799_v18 = vpop.f32.mrf.mxu1 }
 0x10c   :  { %v306_v20 = vadd.f32 %v2799_v18, %v2647_v16 }
 0x10d   :  { %v300_v21 = vpop.f32.mrf.mxu1 }
 0x10e   :  { %v301_v23 = vadd.f32 %v2647_v16, %v300_v21  ;;  %413 = vrot.lane.b32.xlu0 %v306_v20, %s3155_s24  ;;  %2817 = vmatpush3.xpose.msk.msra.mxu1 %vm443_vm2, %v306_v20 }
 0x10f   :  { %2826 = vmatprep.subr.mxu1 %v3153_v14 }
 0x110   :  { %2812 = vmatpush3.xpose.msk.msra.mxu0 %vm443_vm2, %v301_v23 }
 0x111   :  { %v2788_v17 = vpop.f32.mrf.mxu0  ;;  %2821 = vmatprep.subr.mxu0 %v3153_v14 }
 0x112   :  { %v220_v19 = vadd.f32 %v2788_v17, %v2644_v15  ;;  %411 = vrot.lane.b32.xlu0 %v301_v23, %s3155_s24 }
 0x113   :  { %v214_v22 = vpop.f32.mrf.mxu0 }
 0x114   :  { %399 = vrot.lane.b32.xlu1 %v220_v19, %s3155_s24  ;;  %v215_v24 = vadd.f32 %v2644_v15, %v214_v22  ;;  %2819 = vmatmul.mubr.msk.f32.vlgmr.msra.gmra.mxu1 %vm443_vm2, %v220_v19 }
 0x115   :  { %2828 = vmatprep.mubr.msk.f32.mxu1 %vm3154_vm1, %v3153_v14 }
 0x116   :  { %2814 = vmatmul.mubr.msk.f32.vlgmr.msra.gmra.mxu0 %vm443_vm2, %v215_v24  ;;  %415 = vrot.lane.b32.xlu0 %v301_v23, %s3156_s5 }
 0x117   :  { %2823 = vmatprep.mubr.msk.f32.mxu0 %vm3154_vm1, %v3153_v14 }
 0x118   :  { %417 = vrot.lane.b32.xlu1 %v306_v20, %s3156_s5 }
 0x119   :  { %v2810_v33 = vpop.f32.mrf.mxu0 }
 0x11a   :  { %401 = vrot.lane.b32.xlu0 %v215_v24, %s3156_s5  ;;  %v3374_v39 = vadd.f32 %v2810_v33, %v2650_v34 }
 0x11b   :  { %v386_v37 = vpop.f32.mrf.mxu0 }
 0x11c   :  { %397 = vrot.lane.b32.xlu1 %v215_v24, %s3155_s24  ;;  %v3371_v38 = vadd.f32 %v2650_v34, %v386_v37 }
 0x11e   :  { %419 = vrot.lane.b32.xlu0 %v301_v23, %s3157_s6 }
 0x120   :  { %403 = vrot.lane.b32.xlu1 %v220_v19, %s3156_s5 }
 0x122   :  { %405 = vrot.lane.b32.xlu0 %v215_v24, %s3157_s6 }
 0x124   :  { %421 = vrot.lane.b32.xlu1 %v306_v20, %s3157_s6 }
 0x128   :  { %407 = vrot.lane.b32.xlu1 %v220_v19, %s3157_s6 }
 0x180   :  { %v414_v25 = vpop.permute.xlu0 %413 }
 0x181   :  { %2827 = vmatpush3.xpose.msk.msra.mxu1 %vm443_vm2, %v414_v25 }
 0x182   :  { %2836 = vmatprep.subr.mxu1 %v3153_v14 }
 0x184   :  { %v412_v27 = vpop.permute.xlu0 %411 }
 0x185   :  { %2822 = vmatpush3.xpose.msk.msra.mxu0 %vm443_vm2, %v412_v27 }
 0x186   :  { %v400_v26 = vpop.permute.xlu1 %399  ;;  %2831 = vmatprep.subr.mxu0 %v3153_v14 }
 0x187   :  { %2829 = vmatmul.mubr.msk.f32.vlgmr.msra.gmra.mxu1 %vm443_vm2, %v400_v26 }
 0x188   :  { %2838 = vmatprep.mubr.msk.f32.mxu1 %vm3154_vm1, %v3153_v14  ;;  %v416_v29 = vpop.permute.xlu0 %415 }
 0x18a   :  { %v418_v28 = vpop.permute.xlu1 %417 }
 0x18b   :  { %2837 = vmatpush3.xpose.msk.msra.mxu1 %vm443_vm2, %v418_v28 }
 0x18c   :  { %2846 = vmatprep.subr.mxu1 %v3153_v14  ;;  %v402_v31 = vpop.permute.xlu0 %401 }
 0x18e   :  { %v398_v30 = vpop.permute.xlu1 %397 }
 0x18f   :  { %2824 = vmatmul.mubr.msk.f32.vlgmr.msra.gmra.mxu0 %vm443_vm2, %v398_v30 }
 0x190   :  { %2832 = vmatpush3.xpose.msk.msra.mxu0 %vm443_vm2, %v416_v29  ;;  %2833 = vmatprep.mubr.msk.f32.mxu0 %vm3154_vm1, %v3153_v14  ;;  %v420_v35 = vpop.permute.xlu0 %419 }
 0x191   :  { %2841 = vmatprep.subr.mxu0 %v3153_v14 }
 0x192   :  { %v404_v32 = vpop.permute.xlu1 %403 }
 0x193   :  { %2834 = vmatmul.mubr.msk.f32.vlgmr.msra.gmra.mxu0 %vm443_vm2, %v402_v31  ;;  %2839 = vmatmul.mubr.msk.f32.vlgmr.msra.gmra.mxu1 %vm443_vm2, %v404_v32 }
 0x194   :  { %2848 = vmatprep.mubr.msk.f32.mxu1 %vm3154_vm1, %v3153_v14  ;;  %2843 = vmatprep.mubr.msk.f32.mxu0 %vm3154_vm1, %v3153_v14  ;;  %v406_v40 = vpop.permute.xlu0 %405 }
 0x195   :  { %2842 = vmatpush3.xpose.msk.msra.mxu0 %vm443_vm2, %v420_v35 }
 0x196   :  { %v422_v36 = vpop.permute.xlu1 %421  ;;  %2851 = vmatprep.subr.mxu0 %v3153_v14 }
 0x197   :  { %2847 = vmatpush3.xpose.msk.msra.mxu1 %vm443_vm2, %v422_v36 }
 0x198   :  { %2856 = vmatprep.subr.mxu1 %v3153_v14  ;;  %2844 = vmatmul.mubr.msk.f32.vlgmr.msra.gmra.mxu0 %vm443_vm2, %v406_v40 }
 0x199   :  { %2852 = vmatpush3.msra.mxu0 %v3371_v38  ;;  %2853 = vmatprep.mubr.msk.f32.mxu0 %vm3154_vm1, %v3153_v14 }
 0x19a   :  { %v408_v41 = vpop.permute.xlu1 %407  ;;  %2861 = vmatprep.subr.mxu0 %v3153_v14 }
 0x19b   :  { %2849 = vmatmul.mubr.msk.f32.vlgmr.msra.gmra.mxu1 %vm443_vm2, %v408_v41 }
 0x19c   :  { %2857 = vmatpush3.msra.mxu1 %v3374_v39  ;;  %2858 = vmatprep.mubr.msk.f32.mxu1 %vm3154_vm1, %v3153_v14 }
 0x19d   :  { %2866 = vmatprep.subr.mxu1 %v3153_v14 }
 0x1d4   :  { %v588_v42 = vpop.f32.mrf.mxu1 }
 0x1d5   :  { %v1037_v43 = vmul.f32 0.35355338, %v588_v42 }
 0x1d6   :  { %v514_v44 = vpop.f32.mrf.mxu0  ;;  %v2820_v45 = vpop.f32.mrf.mxu1 }
 0x1d7   :  { %v1036_v46 = vmul.f32 0.35355338, %v514_v44  ;;  %v1047_v47 = vsel %vm443_vm2, %v1037_v43, -inf }
 0x1d8   :  { %1048 = vmax.xlane.f32.xlu1 %v1047_v47  ;;  %v2815_v48 = vpop.f32.mrf.mxu0 }
 0x1d9   :  { %v1044_v49 = vsel %vm443_vm2, %v1036_v46, -inf }
 0x1da   :  { %1045 = vmax.xlane.f32.xlu0 %v1044_v49 }
 0x247   :  { %v736_v50 = vpop.f32.mrf.mxu1 }
 0x248   :  { %v1039_v55 = vmul.f32 0.35355338, %v736_v50 }
 0x249   :  { %v2830_v51 = vpop.f32.mrf.mxu1 }
 0x24a   :  { %v1053_v63 = vsel %vm443_vm2, %v1039_v55, -inf }
 0x24f   :  { %v662_v52 = vpop.f32.mrf.mxu0 }
 0x250   :  { %v1038_v53 = vmul.f32 0.35355338, %v662_v52 }
 0x251   :  { %v2825_v54 = vpop.f32.mrf.mxu0 }
 0x252   :  { %v1050_v56 = vsel %vm443_vm2, %v1038_v53, -inf }
 0x253   :  { %v884_v57 = vpop.f32.mrf.mxu1  ;;  %1051 = vmax.xlane.f32.xlu0 %v1050_v56  ;;  %v810_v58 = vpop.f32.mrf.mxu0 }
 0x254   :  { %v1040_v59 = vmul.f32 0.35355338, %v810_v58  ;;  %v1041_v62 = vmul.f32 0.35355338, %v884_v57 }
 0x255   :  { %v2835_v60 = vpop.f32.mrf.mxu0  ;;  %v2840_v61 = vpop.f32.mrf.mxu1 }
 0x256   :  { %v1056_v0 = vsel %vm443_vm2, %v1040_v59, -inf  ;;  %v1059_v1 = vsel %vm443_vm2, %v1041_v62, -inf }
 0x257   :  { %1054 = vmax.xlane.f32.xlu0 %v1053_v63  ;;  %1057 = vmax.xlane.f32.xlu1 %v1056_v0 }
 0x258   :  { %v958_v2 = vpop.f32.mrf.mxu0 }
 0x259   :  { %v1042_v4 = vmul.f32 0.35355338, %v958_v2 }
 0x25a   :  { %v2845_v6 = vpop.f32.mrf.mxu0 }
 0x25b   :  { %v1032_v3 = vpop.f32.mrf.mxu1  ;;  %1060 = vmax.xlane.f32.xlu0 %v1059_v1  ;;  %v1062_v10 = vsel %vm443_vm2, %v1042_v4, -inf }
 0x25c   :  { %v1043_v5 = vmul.f32 0.35355338, %v1032_v3  ;;  %1063 = vmax.xlane.f32.xlu1 %v1062_v10 }
 0x25d   :  { %v2850_v7 = vpop.f32.mrf.mxu1 }
 0x25e   :  { %v1065_v11 = vsel %vm443_vm2, %v1043_v5, -inf }
 0x25f   :  { %1066 = vmax.xlane.f32.xlu0 %v1065_v11 }
 0x261   :  { %v1049_v12 = vpop.xlane.xlu1 %1048 }
 0x262   :  { %v1069_v13 = vsub.f32 %v1037_v43, %v1049_v12 }
 0x263   :  { %v1046_v16 = vpop.xlane.xlu0 %1045 }
 0x264   :  { %v1078_v15 = vmul.f32 1.442695, %v1069_v13  ;;  %v1068_v17 = vsub.f32 %v1036_v46, %v1046_v16 }
 0x266   :  { %2974 = vpow2.f32 %v1078_v15  ;;  %v1076_v18 = vmul.f32 1.442695, %v1068_v17 }
 0x268   :  { %2976 = vpow2.f32 %v1076_v18 }
 0x26d   :  { %425 = vrot.lane.b32.xlu1 %v3371_v38, %s3155_s24 }
 0x271   :  { %431 = vrot.lane.b32.xlu1 %v3371_v38, %s3156_s5 }
 0x273   :  { %v2975_v19 = vpop.eup %2974 }
 0x274   :  { %v1095_v20 = vsel %vm443_vm2, %v2975_v19, 0.0 }
 0x275   :  { %427 = vrot.lane.b32.xlu0 %v3374_v39, %s3155_s24  ;;  %433 = vrot.lane.b32.xlu1 %v3374_v39, %s3156_s5  ;;  %v2977_v21 = vpop.eup %2976 }
 0x276   :  { %v1092_v22 = vsel %vm443_vm2, %v2977_v21, 0.0 }
 0x294   :  { %1096 = vadd.xlane.f32.xlu0 %v1095_v20 }
 0x299   :  { %1093 = vadd.xlane.f32.xlu1 %v1092_v22 }
 0x2dc   :  { %v1052_v23 = vpop.xlane.xlu0 %1051 }
 0x2dd   :  { %v1070_v24 = vsub.f32 %v1038_v53, %v1052_v23  ;;  %v1717_v23 = vld [vmem:[%s3580_s8 + $0x8] sm:$0xff] }
 0x2df   :  { %v1080_v25 = vmul.f32 1.442695, %v1070_v24  ;;  %v1719_v24 = vld [vmem:[%s3580_s8 + $0x18] sm:$0xff] }
 0x2e0   :  { %v1055_v26 = vpop.xlane.xlu0 %1054  ;;  %v1058_v27 = vpop.xlane.xlu1 %1057 }
 0x2e1   :  { %2978 = vpow2.f32 %v1080_v25  ;;  %v1071_v28 = vsub.f32 %v1039_v55, %v1055_v26  ;;  %v1072_v29 = vsub.f32 %v1040_v59, %v1058_v27  ;;  %v1718_v27 = vld [vmem:[%s3580_s8 + $0x10] sm:$0xff] }
 0x2e3   :  { %v1082_v30 = vmul.f32 1.442695, %v1071_v28  ;;  %v1084_v31 = vmul.f32 1.442695, %v1072_v29 }
 0x2e4   :  { %v1061_v32 = vpop.xlane.xlu0 %1060 }
 0x2e5   :  { %2980 = vpow2.f32 %v1082_v30  ;;  %v1073_v33 = vsub.f32 %v1041_v62, %v1061_v32  ;;  %v1064_v35 = vpop.xlane.xlu1 %1063  ;;  %v1720_v30 = vld [vmem:[%s3580_s8 + $0x20] sm:$0xff] }
 0x2e6   :  { %2982 = vpow2.f32 %v1084_v31  ;;  %v1074_v37 = vsub.f32 %v1042_v4, %v1064_v35  ;;  %v1722_v35 = vld [vmem:[%s3580_s8 + $0x30] sm:$0xff] }
 0x2e7   :  { %v1086_v34 = vmul.f32 1.442695, %v1073_v33  ;;  %v1721_v33 = vld [vmem:[%s3580_s8 + $0x28] sm:$0xff] }
 0x2e8   :  { %v1067_v36 = vpop.xlane.xlu0 %1066  ;;  %v1088_v41 = vmul.f32 1.442695, %v1074_v37 }
 0x2e9   :  { %2984 = vpow2.f32 %v1086_v34  ;;  %v1075_v40 = vsub.f32 %v1043_v5, %v1067_v36  ;;  %v426_v55 = vpop.permute.xlu1 %425 }
 0x2ea   :  { %2986 = vpow2.f32 %v1088_v41  ;;  %v1723_v41 = vld [vmem:[%s3580_s8 + $0x38] sm:$0xff] }
 0x2eb   :  { %v1090_v42 = vmul.f32 1.442695, %v1075_v40 }
 0x2ec   :  { %v428_v56 = vpop.permute.xlu0 %427 }
 0x2ed   :  { %2988 = vpow2.f32 %v1090_v42  ;;  %v432_v57 = vpop.permute.xlu1 %431 }
 0x2ee   :  { %v2979_v43 = vpop.eup %2978 }
 0x2ef   :  { %v1098_v44 = vsel %vm443_vm2, %v2979_v43, 0.0 }
 0x2f0   :  { %1099 = vadd.xlane.f32.xlu1 %v1098_v44 }
 0x2f1   :  { %v434_v59 = vpop.permute.xlu1 %433 }
 0x2f2   :  { %v2981_v45 = vpop.eup %2980 }
 0x2f3   :  { %v2983_v46 = vpop.eup %2982  ;;  %v1101_v47 = vsel %vm443_vm2, %v2981_v45, 0.0 }
 0x2f4   :  { %1102 = vadd.xlane.f32.xlu0 %v1101_v47  ;;  %v1104_v48 = vsel %vm443_vm2, %v2983_v46, 0.0 }
 0x2f5   :  { %1105 = vadd.xlane.f32.xlu1 %v1104_v48 }
 0x2f6   :  { %v2985_v49 = vpop.eup %2984 }
 0x2f7   :  { %v1107_v50 = vsel %vm443_vm2, %v2985_v49, 0.0  ;;  %v3409_v51 = vpop.eup %2986 }
 0x2f8   :  { %1108 = vadd.xlane.f32.xlu0 %v1107_v50  ;;  %v1110_v53 = vsel %vm443_vm2, %v3409_v51, 0.0 }
 0x2f9   :  { %1111 = vadd.xlane.f32.xlu1 %v1110_v53 }
 0x2fa   :  { %v3411_v52 = vpop.eup %2988 }
 0x2fb   :  { %v1113_v54 = vsel %vm443_vm2, %v3411_v52, 0.0 }
 0x2fc   :  { %1114 = vadd.xlane.f32.xlu0 %v1113_v54 }
 0x30a   :  { %439 = vrot.lane.b32.xlu1 %v3374_v39, %s3157_s6 }
 0x312   :  { %437 = vrot.lane.b32.xlu0 %v3371_v38, %s3157_s6 }
 0x31d   :  { %v1097_v58 = vpop.xlane.xlu0 %1096 }
 0x31e   :  { %2990 = vrcp.f32 %v1097_v58 }
 0x322   :  { %v1094_v60 = vpop.xlane.xlu1 %1093 }
 0x323   :  { %2992 = vrcp.f32 %v1094_v60 }
 0x32b   :  { %v2991_v61 = vpop.eup %2990 }
 0x32c   :  { %v1125_v62 = vmul.f32 %v2991_v61, %v2975_v19 }
 0x32e   :  { %2859 = vmatmul.mubr.msk.f32.vlgmr.msra.gmra.mxu1 %vm443_vm2, %v1125_v62 }
 0x32f   :  { %2867 = vmatpush3.msra.mxu1 %v428_v56  ;;  %2868 = vmatprep.mubr.msk.f32.mxu1 %vm3154_vm1, %v3153_v14 }
 0x330   :  { %2876 = vmatprep.subr.mxu1 %v3153_v14  ;;  %v2993_v39 = vpop.eup %2992 }
 0x331   :  { %v1124_v38 = vmul.f32 %v2993_v39, %v2977_v21  ;;  %v1716_v21 = vld [vmem:[%s3580_s8] sm:$0xff] }
 0x333   :  { %2854 = vmatmul.mubr.msk.f32.vlgmr.msra.gmra.mxu0 %vm443_vm2, %v1124_v38  ;;  %v2685_v38 = vld [vmem:[%s3581_s9] ss:$0 sm:$0xff] }
 0x334   :  { %2862 = vmatpush3.msra.mxu0 %v426_v55  ;;  %2863 = vmatprep.mubr.msk.f32.mxu0 %vm3154_vm1, %v3153_v14 }
 0x335   :  { %2871 = vmatprep.subr.mxu0 %v3153_v14 }
 0x379   :  { %v1100_v63 = vpop.xlane.xlu1 %1099 }
 0x37a   :  { %2994 = vrcp.f32 %v1100_v63 }
 0x37d   :  { %v1103_v0 = vpop.xlane.xlu0 %1102 }
 0x37e   :  { %2996 = vrcp.f32 %v1103_v0  ;;  %v1106_v1 = vpop.xlane.xlu1 %1105 }
 0x37f   :  { %2998 = vrcp.f32 %v1106_v1 }
 0x381   :  { %v1109_v2 = vpop.xlane.xlu0 %1108 }
 0x382   :  { %3000 = vrcp.f32 %v1109_v2  ;;  %v1112_v3 = vpop.xlane.xlu1 %1111 }
 0x383   :  { %3002 = vrcp.f32 %v1112_v3 }
 0x385   :  { %v1115_v4 = vpop.xlane.xlu0 %1114 }
 0x386   :  { %3004 = vrcp.f32 %v1115_v4  ;;  %v440_v18 = vpop.permute.xlu1 %439 }
 0x387   :  { %v2995_v5 = vpop.eup %2994 }
 0x388   :  { %v1126_v6 = vmul.f32 %v2995_v5, %v2979_v43 }
 0x389   :  { %v438_v15 = vpop.permute.xlu0 %437 }
 0x38a   :  { %2864 = vmatmul.mubr.msk.f32.vlgmr.msra.gmra.mxu0 %vm443_vm2, %v1126_v6 }
 0x38b   :  { %v2997_v7 = vpop.eup %2996  ;;  %2872 = vmatpush3.msra.mxu0 %v432_v57  ;;  %2873 = vmatprep.mubr.msk.f32.mxu0 %vm3154_vm1, %v3153_v14 }
 0x38c   :  { %v2999_v10 = vpop.eup %2998  ;;  %2881 = vmatprep.subr.mxu0 %v3153_v14  ;;  %v1127_v11 = vmul.f32 %v2997_v7, %v2981_v45 }
 0x38d   :  { %v1128_v12 = vmul.f32 %v2999_v10, %v2983_v46 }
 0x38e   :  { %2869 = vmatmul.mubr.msk.f32.vlgmr.msra.gmra.mxu1 %vm443_vm2, %v1127_v11 }
 0x38f   :  { %v3001_v13 = vpop.eup %3000  ;;  %2874 = vmatmul.mubr.msk.f32.vlgmr.msra.gmra.mxu0 %vm443_vm2, %v1128_v12  ;;  %2877 = vmatpush3.msra.mxu1 %v434_v59 }
 0x390   :  { %2882 = vmatpush3.msra.mxu0 %v438_v15  ;;  %2878 = vmatprep.mubr.msk.f32.mxu1 %vm3154_vm1, %v3153_v14  ;;  %v1129_v16 = vmul.f32 %v3001_v13, %v2985_v49  ;;  %v3003_v17 = vpop.eup %3002 }
 0x391   :  { %2886 = vmatprep.subr.mxu1 %v3153_v14  ;;  %2883 = vmatprep.mubr.msk.f32.mxu0 %vm3154_vm1, %v3153_v14  ;;  %v1130_v20 = vmul.f32 %v3003_v17, %v3409_v51 }
 0x392   :  { %2879 = vmatmul.mubr.msk.f32.vlgmr.msra.gmra.mxu1 %vm443_vm2, %v1129_v16  ;;  %2891 = vmatprep.subr.mxu0 %v3153_v14 }
 0x393   :  { %v3005_v19 = vpop.eup %3004  ;;  %2887 = vmatpush3.msra.mxu1 %v440_v18  ;;  %2888 = vmatprep.mubr.msk.f32.mxu1 %vm3154_vm1, %v3153_v14 }
 0x394   :  { %v1131_v22 = vmul.f32 %v3005_v19, %v3411_v52  ;;  %2896 = vmatprep.subr.mxu1 %v3153_v14  ;;  %2884 = vmatmul.mubr.msk.f32.vlgmr.msra.gmra.mxu0 %vm443_vm2, %v1130_v20 }
 0x395   :  { %2892 = vmatpush3.msra.mxu0 %v1716_v21  ;;  %2893 = vmatprep.mubr.msk.f32.mxu0 %vm3154_vm1, %v3153_v14 }
 0x396   :  { %2889 = vmatmul.mubr.msk.f32.vlgmr.msra.gmra.mxu1 %vm443_vm2, %v1131_v22  ;;  %2901 = vmatprep.subr.mxu0 %v3153_v14  ;;  %v2372_v22 = vld [vmem:[#allocation10 + $0x10] sm:$0xff] }
 0x397   :  { %2897 = vmatpush3.msra.mxu1 %v1717_v23  ;;  %2898 = vmatprep.mubr.msk.f32.mxu1 %vm3154_vm1, %v3153_v14  ;;  %v2371_v23 = vld [vmem:[#allocation10 + $0x8] sm:$0xff] }
 0x398   :  { %2906 = vmatprep.subr.mxu1 %v3153_v14 }
 0x3ee   :  { %v1274_v25 = vpop.f32.mrf.mxu1 }
 0x3ef   :  { %2899 = vmatmul.mubr.msk.f32.vlgmr.msra.gmra.mxu1 %vm443_vm2, %v1274_v25 }
 0x3f0   :  { %v2860_v26 = vpop.f32.mrf.mxu1  ;;  %2907 = vmatpush3.msra.mxu1 %v1719_v24  ;;  %2908 = vmatprep.mubr.msk.f32.mxu1 %vm3154_vm1, %v3153_v14  ;;  %v2370_v24 = vld [vmem:[#allocation10] sm:$0xff] }
 0x3f1   :  { %2916 = vmatprep.subr.mxu1 %v3153_v14 }
 0x3f3   :  { %v1201_v28 = vpop.f32.mrf.mxu0 }
 0x3f4   :  { %2894 = vmatmul.mubr.msk.f32.vlgmr.msra.gmra.mxu0 %vm443_vm2, %v1201_v28 }
 0x3f5   :  { %v2855_v29 = vpop.f32.mrf.mxu0  ;;  %2902 = vmatpush3.msra.mxu0 %v1718_v27  ;;  %2903 = vmatprep.mubr.msk.f32.mxu0 %vm3154_vm1, %v3153_v14 }
 0x3f6   :  { %2911 = vmatprep.subr.mxu0 %v3153_v14 }
 0x44a   :  { %v1347_v31 = vpop.f32.mrf.mxu0 }
 0x44b   :  { %2904 = vmatmul.mubr.msk.f32.vlgmr.msra.gmra.mxu0 %vm443_vm2, %v1347_v31 }
 0x44c   :  { %v2865_v32 = vpop.f32.mrf.mxu0  ;;  %2912 = vmatpush3.msra.mxu0 %v1720_v30  ;;  %2913 = vmatprep.mubr.msk.f32.mxu0 %vm3154_vm1, %v3153_v14 }
 0x44d   :  { %2921 = vmatprep.subr.mxu0 %v3153_v14  ;;  %v2686_v32 = vld [vmem:[%s3582_s10] ss:$0 sm:$0xff] }
 0x44e   :  { %v1420_v34 = vpop.f32.mrf.mxu1 }
 0x44f   :  { %v1493_v36 = vpop.f32.mrf.mxu0  ;;  %2909 = vmatmul.mubr.msk.f32.vlgmr.msra.gmra.mxu1 %vm443_vm2, %v1420_v34  ;;  %v2687_v34 = vld [vmem:[%s3583_s11] ss:$0 sm:$0xff] }
 0x450   :  { %2914 = vmatmul.mubr.msk.f32.vlgmr.msra.gmra.mxu0 %vm443_vm2, %v1493_v36  ;;  %v2870_v37 = vpop.f32.mrf.mxu1  ;;  %2917 = vmatpush3.msra.mxu1 %v1721_v33 }
 0x451   :  { %v2875_v40 = vpop.f32.mrf.mxu0  ;;  %2918 = vmatprep.mubr.msk.f32.mxu1 %vm3154_vm1, %v3153_v14  ;;  %2922 = vmatpush3.msra.mxu0 %v1722_v35 }
 0x452   :  { %v1566_v42 = vpop.f32.mrf.mxu1  ;;  %2926 = vmatprep.subr.mxu1 %v3153_v14  ;;  %2923 = vmatprep.mubr.msk.f32.mxu0 %vm3154_vm1, %v3153_v14 }
 0x453   :  { %2919 = vmatmul.mubr.msk.f32.vlgmr.msra.gmra.mxu1 %vm443_vm2, %v1566_v42 }
 0x454   :  { %v2880_v43 = vpop.f32.mrf.mxu1  ;;  %2927 = vmatpush3.msra.mxu1 %v1723_v41  ;;  %2928 = vmatprep.mubr.msk.f32.mxu1 %vm3154_vm1, %v3153_v14  ;;  %v1639_v44 = vpop.f32.mrf.mxu0 }
 0x455   :  { %2924 = vmatmul.mubr.msk.f32.vlgmr.msra.gmra.mxu0 %vm443_vm2, %v1639_v44  ;;  %v2487_v43 = vld [vmem:[%s3586_s14 + $0x38] sm:$0xff]  ;;  %v2486_v44 = vld [vmem:[%s3586_s14 + $0x30] sm:$0xff] }
 0x456   :  { %v1712_v45 = vpop.f32.mrf.mxu1  ;;  %v2885_v46 = vpop.f32.mrf.mxu0  ;;  %2942 = vmatprep.subr.mxu1 %v2487_v43 }
 0x457   :  { %2929 = vmatmul.mubr.msk.f32.vlgmr.msra.gmra.mxu1 %vm443_vm2, %v1712_v45  ;;  %v2485_v45 = vld [vmem:[%s3586_s14 + $0x28] sm:$0xff]  ;;  %v2484_v46 = vld [vmem:[%s3586_s14 + $0x20] sm:$0xff] }
 0x458   :  { %v2890_v47 = vpop.f32.mrf.mxu1  ;;  %2943 = vmatpush3.msra.mxu1 %v2487_v43 }
 0x459   :  { %2944 = vmatprep.subr.mxu1 %v2486_v44  ;;  %v2483_v47 = vld [vmem:[%s3586_s14 + $0x18] sm:$0xff] }
 0x45a   :  { %2945 = vmatpush3.msra.mxu1 %v2486_v44 }
 0x45b   :  { %2946 = vmatprep.subr.mxu1 %v2485_v45 }
 0x45c   :  { %2947 = vmatpush3.msra.mxu1 %v2485_v45 }
 0x45d   :  { %2948 = vmatprep.subr.mxu1 %v2484_v46 }
 0x45e   :  { %2949 = vmatpush3.msra.mxu1 %v2484_v46 }
 0x45f   :  { %2950 = vmatprep.subr.mxu1 %v2483_v47 }
 0x460   :  { %2951 = vmatpush3.msra.mxu1 %v2483_v47 }
 0x4af   :  { %v1866_v48 = vpop.f32.mrf.mxu1 }
 0x4b1   :  { %v2900_v49 = vpop.f32.mrf.mxu1 }
 0x4b2   :  { %v2481_v49 = vld [vmem:[%s3586_s14 + $0x8] sm:$0xff] }
 0x4b4   :  { %v1793_v50 = vpop.f32.mrf.mxu0 }
 0x4b6   :  { %v2895_v51 = vpop.f32.mrf.mxu0 }
 0x4b7   :  { %v2688_v51 = vld [vmem:[%s3585_s13] ss:$0 sm:$0xff] }
 0x50b   :  { %v1939_v52 = vpop.f32.mrf.mxu0 }
 0x50c   :  { %v2308_v58 = vadd.f32 %v1939_v52, %v1793_v50  ;;  %v2480_v50 = vld [vmem:[%s3586_s14] sm:$0xff] }
 0x50d   :  { %v2905_v53 = vpop.f32.mrf.mxu0 }
 0x50f   :  { %v2012_v54 = vpop.f32.mrf.mxu1 }
 0x510   :  { %v2085_v55 = vpop.f32.mrf.mxu0  ;;  %v2309_v59 = vadd.f32 %v2012_v54, %v1866_v48  ;;  %v2482_v48 = vld [vmem:[%s3586_s14 + $0x10] sm:$0xff] }
 0x511   :  { %v2910_v56 = vpop.f32.mrf.mxu1  ;;  %v2310_v60 = vadd.f32 %v2308_v58, %v2085_v55  ;;  %2952 = vmatprep.subr.mxu1 %v2482_v48 }
 0x512   :  { %v2915_v57 = vpop.f32.mrf.mxu0  ;;  %2953 = vmatpush3.msra.mxu1 %v2482_v48 }
 0x513   :  { %v2158_v14 = vpop.f32.mrf.mxu1  ;;  %2954 = vmatprep.subr.mxu1 %v2481_v49 }
 0x514   :  { %v2311_v62 = vadd.f32 %v2309_v59, %v2158_v14  ;;  %2955 = vmatpush3.msra.mxu1 %v2481_v49 }
 0x515   :  { %v2920_v61 = vpop.f32.mrf.mxu1  ;;  %v2231_v39 = vpop.f32.mrf.mxu0  ;;  %2956 = vmatprep.subr.mxu1 %v2480_v50 }
 0x516   :  { %v2312_v63 = vadd.f32 %v2310_v60, %v2231_v39  ;;  %2957 = vmatpush3.msra.mxu1 %v2480_v50 }
 0x517   :  { %v2304_v0 = vpop.f32.mrf.mxu1  ;;  %v2925_v2 = vpop.f32.mrf.mxu0 }
 0x518   :  { %v2313_v1 = vadd.f32 %v2311_v62, %v2304_v0  ;;  %v2321_v3 = vadd.f32 %v2685_v38, %v2312_v63 }
 0x519   :  { %v2930_v4 = vpop.f32.mrf.mxu1 }
 0x51a   :  { %v2322_v5 = vadd.f32 %v2685_v38, %v2313_v1  ;;  %v2323_v6 = vadd.f32 %v2321_v3, %v3296_v8 }
 0x51c   :  { %v2324_v7 = vadd.f32 %v2322_v5, %v3298_v9  ;;  %v2327_v10 = vsel %vm141_vm0, %v2323_v6, 0.0  ;;  %v2373_v9 = vld [vmem:[#allocation10 + $0x18] sm:$0xff] }
 0x51d   :  { %2328 = vadd.xlane.f32.xlu0 %v2327_v10  ;;  %2931 = vmatprep.subr.mxu0 %v2373_v9 }
 0x51e   :  { %v2330_v11 = vsel %vm141_vm0, %v2324_v7, 0.0  ;;  %2932 = vmatpush3.msra.mxu0 %v2373_v9 }
 0x51f   :  { %2331 = vadd.xlane.f32.xlu1 %v2330_v11  ;;  %2933 = vmatprep.subr.mxu0 %v2372_v22 }
 0x520   :  { %2934 = vmatpush3.msra.mxu0 %v2372_v22 }
 0x521   :  { %2935 = vmatprep.subr.mxu0 %v2371_v23 }
 0x522   :  { %2936 = vmatpush3.msra.mxu0 %v2371_v23 }
 0x523   :  { %2937 = vmatprep.subr.mxu0 %v2370_v24 }
 0x524   :  { %2938 = vmatpush3.msra.mxu0 %v2370_v24 }
 0x5a6   :  { %v2329_v12 = vpop.xlane.xlu0 %2328 }
 0x5a7   :  { %v2334_v15 = vmul.f32 0.03125, %v2329_v12 }
 0x5a8   :  { %v2332_v13 = vpop.xlane.xlu1 %2331 }
 0x5a9   :  { %v2335_v16 = vmul.f32 0.03125, %v2332_v13  ;;  %v2336_v17 = vsub.f32 %v2323_v6, %v2334_v15 }
 0x5ab   :  { %v2337_v18 = vsub.f32 %v2324_v7, %v2335_v16  ;;  %v2338_v19 = vmul.f32 %v2336_v17, %v2336_v17  ;;  %v2691_v7 = vld [vmem:[%s3587_s15] ss:$0 sm:$0xff] }
 0x5ad   :  { %v2340_v20 = vsel %vm141_vm0, %v2338_v19, 0.0  ;;  %v2339_v21 = vmul.f32 %v2337_v18, %v2337_v18 }
 0x5ae   :  { %2341 = vadd.xlane.f32.xlu0 %v2340_v20 }
 0x5af   :  { %v2343_v8 = vsel %vm141_vm0, %v2339_v21, 0.0 }
 0x5b2   :  { %2344 = vadd.xlane.f32.xlu0 %v2343_v8 }
 0x637   :  { %v2342_v25 = vpop.xlane.xlu0 %2341 }
 0x638   :  { %v2346_v26 = vmul.f32 0.03125, %v2342_v25 }
 0x63a   :  { %v2348_v27 = vadd.f32 1e-05, %v2346_v26 }
 0x63b   :  { %v2345_v28 = vpop.xlane.xlu0 %2344 }
 0x63c   :  { %3006 = vrsqrt.f32 %v2348_v27  ;;  %v2347_v29 = vmul.f32 0.03125, %v2345_v28 }
 0x63e   :  { %v2349_v30 = vadd.f32 1e-05, %v2347_v29 }
 0x640   :  { %3008 = vrsqrt.f32 %v2349_v30 }
 0x649   :  { %v3007_v31 = vpop.eup %3006 }
 0x64a   :  { %v2352_v33 = vmul.f32 %v3007_v31, %v2336_v17 }
 0x64c   :  { %v2360_v35 = vmul.f32 %v2686_v32, %v2352_v33 }
 0x64d   :  { %v3009_v36 = vpop.eup %3008 }
 0x64e   :  { %v2353_v37 = vmul.f32 %v3009_v36, %v2337_v18  ;;  %v3518_v40 = vadd.f32 %v2687_v34, %v2360_v35 }
 0x650   :  { %v2361_v41 = vmul.f32 %v2686_v32, %v2353_v37  ;;  %2939 = vmatprep.mubr.msk.f32.mxu0 %vm141_vm0, %v3518_v40  ;;  %v2695_v37 = vld [vmem:[%s3589_s17] ss:$0 sm:$0xff] }
 0x652   :  { %v2369_v42 = vadd.f32 %v2687_v34, %v2361_v41  ;;  %v2694_v34 = vld [vmem:[%s3588_s16] ss:$0 sm:$0xff] }
 0x654   :  { %2940 = vmatmul.mubr.msk.f32.vlgmr.msra.gmra.mxu0 %vm141_vm0, %v2369_v42 }
 0x714   :  { %v2941_v52 = vpop.f32.mrf.mxu0 }
 0x715   :  { %v2459_v53 = vadd.f32 %v2941_v52, %v2688_v51 }
 0x716   :  { %v2453_v54 = vpop.f32.mrf.mxu0 }
 0x717   :  { %v2465_v55 = vmul.f32 0.044715, %v2459_v53  ;;  %v2454_v56 = vadd.f32 %v2688_v51, %v2453_v54  ;;  %v2463_v4 = vmul.f32 0.5, %v2459_v53 }
 0x719   :  { %v2467_v57 = vmul.f32 %v2465_v55, %v2459_v53  ;;  %v2464_v58 = vmul.f32 0.044715, %v2454_v56  ;;  %v2462_v2 = vmul.f32 0.5, %v2454_v56 }
 0x71b   :  { %v2469_v14 = vmul.f32 %v2467_v57, %v2459_v53  ;;  %v2466_v59 = vmul.f32 %v2464_v58, %v2454_v56 }
 0x71d   :  { %v2471_v60 = vadd.f32 %v2469_v14, %v2459_v53  ;;  %v2468_v61 = vmul.f32 %v2466_v59, %v2454_v56 }
 0x71f   :  { %v2473_v62 = vmul.f32 0.7978846, %v2471_v60  ;;  %v2470_v39 = vadd.f32 %v2468_v61, %v2454_v56 }
 0x721   :  { %3010 = vtanh.f32 %v2473_v62  ;;  %v2472_v38 = vmul.f32 0.7978846, %v2470_v39 }
 0x723   :  { %3012 = vtanh.f32 %v2472_v38 }
 0x72e   :  { %v3011_v63 = vpop.eup %3010 }
 0x72f   :  { %v2477_v1 = vadd.f32 1.0, %v3011_v63 }
 0x730   :  { %v3013_v0 = vpop.eup %3012 }
 0x731   :  { %v2476_v3 = vadd.f32 1.0, %v3013_v0  ;;  %v2479_v6 = vmul.f32 %v2477_v1, %v2463_v4 }
 0x733   :  { %v2478_v5 = vmul.f32 %v2476_v3, %v2462_v2 }
 0x735   :  { %2958 = vmatprep.mubr.msk.f32.mxu1 %vm2495_vm3, %v2478_v5 }
 0x736   :  { %2959 = vmatmul.mubr.msk.f32.vlgmr.msra.gmra.mxu1 %vm2495_vm3, %v2479_v6 }
 0x7f6   :  { %v2960_v10 = vpop.f32.mrf.mxu1 }
 0x7f7   :  { %v2574_v11 = vadd.f32 %v2960_v10, %v2691_v7 }
 0x7f8   :  { %v2568_v12 = vpop.f32.mrf.mxu1 }
 0x7f9   :  { %v2569_v13 = vadd.f32 %v2691_v7, %v2568_v12  ;;  %v2578_v15 = vadd.f32 %v2574_v11, %v2369_v42 }
 0x7fb   :  { %v2584_v16 = vsel %vm141_vm0, %v2578_v15, 0.0  ;;  %v2577_v17 = vadd.f32 %v2569_v13, %v3518_v40 }
 0x7fc   :  { %2585 = vadd.xlane.f32.xlu0 %v2584_v16 }
 0x7fd   :  { %v2581_v18 = vsel %vm141_vm0, %v2577_v17, 0.0 }
 0x7fe   :  { %2582 = vadd.xlane.f32.xlu1 %v2581_v18 }
 0x885   :  { %v2586_v19 = vpop.xlane.xlu0 %2585 }
 0x886   :  { %v2588_v20 = vmul.f32 0.03125, %v2586_v19 }
 0x887   :  { %v2583_v21 = vpop.xlane.xlu1 %2582 }
 0x888   :  { %v2590_v8 = vsub.f32 %v2578_v15, %v2588_v20  ;;  %v2587_v9 = vmul.f32 0.03125, %v2583_v21 }
 0x88a   :  { %v2589_v22 = vsub.f32 %v2577_v17, %v2587_v9  ;;  %v2592_v23 = vmul.f32 %v2590_v8, %v2590_v8 }
 0x88c   :  { %v2596_v24 = vsel %vm141_vm0, %v2592_v23, 0.0  ;;  %v2591_v25 = vmul.f32 %v2589_v22, %v2589_v22 }
 0x88d   :  { %2597 = vadd.xlane.f32.xlu0 %v2596_v24 }
 0x88e   :  { %v2593_v26 = vsel %vm141_vm0, %v2591_v25, 0.0 }
 0x88f   :  { %2594 = vadd.xlane.f32.xlu1 %v2593_v26 }
 0x916   :  { %v2598_v27 = vpop.xlane.xlu0 %2597 }
 0x917   :  { %v2600_v28 = vmul.f32 0.03125, %v2598_v27 }
 0x918   :  { %v2595_v29 = vpop.xlane.xlu1 %2594 }
 0x919   :  { %v2602_v30 = vadd.f32 1e-05, %v2600_v28  ;;  %v2599_v31 = vmul.f32 0.03125, %v2595_v29 }
 0x91b   :  { %3014 = vrsqrt.f32 %v2602_v30  ;;  %v2601_v32 = vadd.f32 1e-05, %v2599_v31 }
 0x91d   :  { %3016 = vrsqrt.f32 %v2601_v32 }
 0x928   :  { %v3015_v33 = vpop.eup %3014 }
 0x929   :  { %v2606_v35 = vmul.f32 %v3015_v33, %v2590_v8 }
 0x92a   :  { %v3017_v36 = vpop.eup %3016 }
 0x92b   :  { %v2605_v40 = vmul.f32 %v3017_v36, %v2589_v22  ;;  %v2614_v41 = vmul.f32 %v2694_v34, %v2606_v35 }
 0x92d   :  { %v2613_v42 = vmul.f32 %v2694_v34, %v2605_v40  ;;  %v2622_v43 = vadd.f32 %v2695_v37, %v2614_v41 }
 0x92f   :  { %v2621_v44 = vadd.f32 %v2695_v37, %v2613_v42  ;;  %2624 = vst.msk [vmem:[#allocation11 + $0x8] sm:$0xff] %vm141_vm0, %v2622_v43 }
 0x931   :  { %2623 = vst.msk [vmem:[#allocation11] sm:$0xff] %vm141_vm0, %v2621_v44 }
 0x932   :  { %3129 = shalt.err (!%p3126_p1)
}
 0x933   :  { %2636 = dma.vmem_to_hbm [thread:$0]  %s2631_s7, 256, %s3590_s18, [#allocation4], %s3148_s19, %s3148_s19, %s3149_s1  }
 0x934   :  { %3144 = dma.done.wait [#allocation4], 256  }
 0x935   :  { %3145 = vsyncadd [#allocation4], 4294967040 }
 0x936   :  { %2640 = vsyncpa [#allocation3], 1 }
 0x937   :  { %2641 = vsyncpa [#allocation6], 1 }
 0x938   :  { %2642 = vsyncpa [#allocation9], 1 }
 0x939   :  { %2643 = vsyncpa [#allocation4], 1 }

</bundles_post_ra>
